<compile_context>
chip_gen: v7x
topology: tpu7x:2x2x1
jax: 0.10.0
libtpu: 0.0.40
codegen_flags: <defaults>
</compile_context>

<pallas_src>
import numpy as np

import jax
import jax.numpy as jnp
from jax.experimental import pallas as pl
from jax.experimental.pallas import tpu as pltpu


# ---------------------------------------------------------------------------
# Constant interpolation matrix (built at trace time in the wrapper).
# ---------------------------------------------------------------------------
def _interp_matrix(f_in: int, out_size: int) -> jnp.ndarray:
    """(f_in, out_size) W such that x @ W == F.interpolate(x[:, None, :],
    size=out_size, mode='linear', align_corners=True) along the last dim."""
    w = np.zeros((f_in, out_size), np.float32)
    if out_size == 1 or f_in == 1:
        # align_corners=True with a single sample pins everything to index 0
        w[0, :] = 1.0
        return jnp.asarray(w)
    scale = (f_in - 1) / (out_size - 1)
    for j in range(out_size):
        pos = j * scale
        lo = min(int(np.floor(pos)), f_in - 1)
        hi = min(lo + 1, f_in - 1)
        frac = pos - lo
        w[lo, j] += 1.0 - frac
        w[hi, j] += frac
    return jnp.asarray(w)


# ---------------------------------------------------------------------------
# Kernels
# ---------------------------------------------------------------------------
def _interp_kernel(x_ref, w_ref, o_ref):
    # (rt, f_in) @ (f_in, out_size) -> one MXU matmul per row tile
    o_ref[...] = jnp.dot(x_ref[...], w_ref[...], preferred_element_type=jnp.float32)


def _interp_gated_kernel(x_ref, w_ref, mask_ref, o_ref):
    gate = jax.nn.sigmoid(mask_ref[...]) * 2.0  # (1, out_size), broadcasts over rows
    y = jnp.dot(x_ref[...], w_ref[...], preferred_element_type=jnp.float32)
    o_ref[...] = y * gate


# ---------------------------------------------------------------------------
# Wrapper
# ---------------------------------------------------------------------------
def time_distributed_interpolation(x, output_size, mask=None, *, row_tile=128):
    """Pallas implementation of TimeDistributedInterpolation.forward.

    x: 2-D (B, F), 3-D (B, T, F) or 4-D (B, C, T, F). mask: optional (output_size,)
    trainable parameter (None == trainable=False). Returns the same shapes as the
    PyTorch module (2-D input -> (B, 1, output_size), matching the unsqueeze(1))."""
    orig_shape = x.shape
    assert x.ndim in (2, 3, 4), "TimeDistributedInterpolation supports 2-D/3-D/4-D"
    f_in = orig_shape[-1]

    x2 = x.reshape(-1, f_in).astype(jnp.float32)
    n = x2.shape[0]

    # Row tile: multiple of 8 (sublane quantum), capped at row_tile.
    n8 = ((n + 7) // 8) * 8
    rt = max(8, min((row_tile // 8) * 8, n8))
    n_pad = ((n + rt - 1) // rt) * rt
    if n_pad != n:
        x2 = jnp.pad(x2, ((0, n_pad - n), (0, 0)))

    w = _interp_matrix(f_in, output_size)

    in_specs = [
        pl.BlockSpec((rt, f_in), lambda i: (i, 0)),              # row tile of x
        pl.BlockSpec((f_in, output_size), lambda i: (0, 0)),     # full W, resident
    ]
    args = [x2, w]
    if mask is not None:
        in_specs.append(pl.BlockSpec((1, output_size), lambda i: (0, 0)))
        args.append(jnp.asarray(mask, jnp.float32).reshape(1, output_size))
        kernel = _interp_gated_kernel
    else:
        kernel = _interp_kernel

    out = pl.pallas_call(
        kernel,
        out_shape=jax.ShapeDtypeStruct((n_pad, output_size), jnp.float32),
        grid=(n_pad // rt,),
        in_specs=in_specs,
        out_specs=pl.BlockSpec((rt, output_size), lambda i: (i, 0)),
        compiler_params=pltpu.CompilerParams(dimension_semantics=("parallel",)),
    )(*args)

    out = out[:n]
    if x.ndim == 2:
        # PyTorch path unsqueezes to (B, 1, F) and never squeezes back
        return out.reshape(orig_shape[0], 1, output_size)
    return out.reshape(*orig_shape[:-1], output_size)


# ---------------------------------------------------------------------------
# Plain-JAX reference (gather + lerp, mirrors F.interpolate align_corners=True)
# ---------------------------------------------------------------------------
def reference(x, output_size, mask=None):
    orig_shape = x.shape
    f_in = orig_shape[-1]
    x2 = x.reshape(-1, f_in).astype(jnp.float32)
    if output_size == 1 or f_in == 1:
        out = jnp.broadcast_to(x2[:, :1], (x2.shape[0], output_size))
    else:
        pos = np.arange(output_size) * ((f_in - 1) / (output_size - 1))
        lo = np.minimum(np.floor(pos).astype(np.int32), f_in - 1)
        hi = np.minimum(lo + 1, f_in - 1)
        frac = jnp.asarray((pos - lo).astype(np.float32))
        out = x2[:, lo] * (1.0 - frac) + x2[:, hi] * frac
    if mask is not None:
        gate = jax.nn.sigmoid(jnp.asarray(mask, jnp.float32).reshape(1, output_size)) * 2.0
        out = out * gate
    if x.ndim == 2:
        return out.reshape(orig_shape[0], 1, output_size)
    return out.reshape(*orig_shape[:-1], output_size)


# ---------------------------------------------------------------------------
if __name__ == "__main__":
    key = jax.random.PRNGKey(0)
    k1, k2, k3, k4 = jax.random.split(key, 4)

    # 3-D (batch, seq, features): upsample 32 -> 64, trainable gating.
    # row_tile=8 gives a grid of 2 steps (exercises pipelining / both v7x TCs).
    x3 = jax.random.normal(k1, (2, 8, 32), jnp.float32)
    mask3 = jax.random.normal(k2, (64,), jnp.float32)
    out3 = jax.block_until_ready(time_distributed_interpolation(x3, 64, mask3, row_tile=8))
    ref3 = reference(x3, 64, mask3)
    assert out3.shape == (2, 8, 64)
    assert bool(jnp.all(jnp.isfinite(out3)))
    assert bool(jnp.allclose(out3, ref3, atol=1e-5, rtol=1e-5))

    # 4-D (batch, channels, seq, features): upsample 16 -> 24, non-trainable.
    # 30 rows -> exercises the row-padding path.
    x4 = jax.random.normal(k3, (2, 3, 5, 16), jnp.float32)
    out4 = jax.block_until_ready(time_distributed_interpolation(x4, 24))
    ref4 = reference(x4, 24)
    assert out4.shape == (2, 3, 5, 24)
    assert bool(jnp.allclose(out4, ref4, atol=1e-5, rtol=1e-5))

    # 2-D (batch, features): downsample 16 -> 8, trainable; output keeps the
    # (B, 1, out) shape exactly like the PyTorch module.
    x2 = jax.random.normal(k4, (4, 16), jnp.float32)
    mask2 = jax.random.normal(k2, (8,), jnp.float32)
    out2 = jax.block_until_ready(time_distributed_interpolation(x2, 8, mask2))
    ref2 = reference(x2, 8, mask2)
    assert out2.shape == (4, 1, 8)
    assert bool(jnp.allclose(out2, ref2, atol=1e-5, rtol=1e-5))

    print("KERNEL_OK")
</pallas_src>

<mosaic_0001>
module attributes {stable_mosaic.version = 11 : i64} {
  func.func @_interp_gated_kernel(%arg0: i32, %arg1: memref<8x32xf32, #tpu.memory_space<vmem>>, %arg2: memref<32x64xf32, #tpu.memory_space<vmem>>, %arg3: memref<1x64xf32, #tpu.memory_space<vmem>>, %arg4: memref<8x64xf32, #tpu.memory_space<vmem>>) attributes {dimension_semantics = [#tpu.dimension_semantics<parallel>], iteration_bounds = array<i64: 2>, scalar_prefetch = 0 : i64, scratch_operands = 0 : i64, tpu.core_type = #tpu.core_type<tc>, window_params = [{transform_indices = @transform_0, window_bounds = array<i64: 8, 32>}, {pipeline_mode = #tpu.pipeline_mode<synchronous>, transform_indices = @transform_1, window_bounds = array<i64: 32, 64>}, {pipeline_mode = #tpu.pipeline_mode<synchronous>, transform_indices = @transform_2, window_bounds = array<i64: 1, 64>}, {transform_indices = @transform_3, window_bounds = array<i64: 8, 64>}]} {
    %c0 = arith.constant 0 : index
    %c0_0 = arith.constant 0 : index
    %0 = vector.load %arg3[%c0, %c0_0] : memref<1x64xf32, #tpu.memory_space<vmem>>, vector<1x64xf32>
    %1 = arith.negf %0 : vector<1x64xf32>
    %2 = math.exp %1 : vector<1x64xf32>
    %cst = arith.constant 1.000000e+00 : f32
    %3 = vector.broadcast %cst : f32 to vector<1x64xf32>
    %4 = arith.addf %3, %2 : vector<1x64xf32>
    %5 = arith.divf %3, %4 : vector<1x64xf32>
    %cst_1 = arith.constant 2.000000e+00 : f32
    %6 = vector.broadcast %cst_1 : f32 to vector<1x64xf32>
    %7 = arith.mulf %5, %6 : vector<1x64xf32>
    %c0_2 = arith.constant 0 : index
    %c0_3 = arith.constant 0 : index
    %8 = vector.load %arg1[%c0_2, %c0_3] : memref<8x32xf32, #tpu.memory_space<vmem>>, vector<8x32xf32>
    %c0_4 = arith.constant 0 : index
    %c0_5 = arith.constant 0 : index
    %9 = vector.load %arg2[%c0_4, %c0_5] : memref<32x64xf32, #tpu.memory_space<vmem>>, vector<32x64xf32>
    %cst_6 = arith.constant dense<0.000000e+00> : vector<8x64xf32>
    %10 = tpu.matmul %8, %9, %cst_6 {dimension_numbers = #tpu.dot_dimension_numbers<[1], [0], [0], [1], [0, 0, 1, 1], [], []>} : vector<8x32xf32>, vector<32x64xf32>, vector<8x64xf32> -> vector<8x64xf32>
    %11 = vector.broadcast %7 : vector<1x64xf32> to vector<8x64xf32>
    %12 = arith.mulf %10, %11 : vector<8x64xf32>
    %c0_7 = arith.constant 0 : index
    %c0_8 = arith.constant 0 : index
    %13 = vector.load %arg4[%c0_7, %c0_8] : memref<8x64xf32, #tpu.memory_space<vmem>>, vector<8x64xf32>
    tpu.vector_store %arg4[%c0_7, %c0_8], %12 {strides = array<i32>} : memref<8x64xf32, #tpu.memory_space<vmem>>, vector<8x64xf32>,
    return
  }
  func.func @transform_0(%arg0: i32) -> (i32, i32) {
    %c0_i32 = arith.constant 0 : i32
    %c0_i32_0 = arith.constant 0 : i32
    return %arg0, %c0_i32 : i32, i32
  }
  func.func @transform_1(%arg0: i32) -> (i32, i32) {
    %c0_i32 = arith.constant 0 : i32
    %c0_i32_0 = arith.constant 0 : i32
    %c0_i32_1 = arith.constant 0 : i32
    return %c0_i32, %c0_i32_0 : i32, i32
  }
  func.func @transform_2(%arg0: i32) -> (i32, i32) {
    %c0_i32 = arith.constant 0 : i32
    %c0_i32_0 = arith.constant 0 : i32
    %c0_i32_1 = arith.constant 0 : i32
    return %c0_i32, %c0_i32_0 : i32, i32
  }
  func.func @transform_3(%arg0: i32) -> (i32, i32) {
    %c0_i32 = arith.constant 0 : i32
    %c0_i32_0 = arith.constant 0 : i32
    return %arg0, %c0_i32 : i32, i32
  }
}

</mosaic_0001>

<bundles_post_ra>
// kernel: tpu_custom_call.1
= control target key start
LH: loop header
LB: loop body
LE: loop exit
PB: predicated region body
PF: predicated region fallthrough
CT: control target
= control target key end

     0   :  { %8 = vsyncpa [#allocation3], 0  ;;  %s856_s0 = inlined_call_operand.hbm [shape: f32[16,32], index: 0, kind: input, shape index: {}]   ;;  %s857_s1 = inlined_call_operand.hbm [shape: f32[32,64], index: 1, kind: input, shape index: {}]   ;;  %s858_s2 = inlined_call_operand.vmem [shape: f32[1,64], index: 2, kind: input, shape index: {}]   ;;  %s859_s3 = inlined_call_operand.hbm [shape: f32[16,64], index: 3, kind: output, shape index: {}]  }
   0x1   :  { %10 = vsyncpa [#allocation3 + $0x1], 0 }
   0x2   :  { %11 = vsyncpa [#allocation6], 0 }
   0x3   :  { %12 = vsyncpa [#allocation4], 0 }
   0x4   :  { %14 = vsyncpa [#allocation4 + $0x1], 0  ;;  %s653_s12 = smov 0   ;;  %s655_s13 = smov 0  }
   0x5   :  { %s657_s14 = smov 0   ;;  %s659_s15 = smov 0  }
   0x6 LB: > { %s674_s16 = sadd.s32 4294967295, %s623_s15   ;;  %s391_s17 = sadd.s32 4294967294, %s623_s15   ;;  %s623_s15 = sphi %s659_s15, %s879_s15   ;;  %s619_s14 = sphi %s657_s14, %s878_s14   ;;  %s615_s13 = sphi %s655_s13, %s877_s13   ;;  %s611_s12 = sphi %s653_s12, %s876_s12  }
   0x7   : > { %p40_p0 = scmp.ne.s32.totalorder %s615_s13, %s611_s12  ;;  %p860_p1 = scmp.eq.s32.totalorder %s674_s16, 0 }
   0x8   : > { %p112_p3 = scmp.eq.s32.totalorder %s391_s17, 1  ;;  %p392_p5 = scmp.ge.s32.totalorder %s623_s15, 1 }
   0x9   : > { %p683_p4 = por %p860_p1, %p40_p0  ;;  %p119_p7 = scmp.lt.s32.totalorder %s623_s15, 3 }
   0xa   : > { %p688_p6 = por %p112_p3, %p40_p0  ;;  %s625_s21 = smov [#allocation5]  }
   0xb   : > { %s863_s18 = scalar_select %p683_p4, 1, 0 }
   0xc   : > { %s864_s19 = scalar_select %p688_p6, 1, 0 }
   0xd   : > { %p693_p8 = pnand %p392_p5, %p119_p7  ;;  %s131_s22 = sshll.u32 %s625_s21, 4  ;;  %s697_s22 = int_to_ptr.vmem [resolvable:$true] %s131_s22 }
   0xe   : > { %s709_s24 = sadd.s32 1, %s623_s15   ;;  %s27_s25 = sadd.s32 1, %s619_s14 }
   0xf   : > { %s865_s20 = scalar_select %p693_p8, 1, 0 }
  0x10   : > { %p437_p9 = pneg %p693_p8  ;;  %s24_s26 = ssub.s32 %s623_s15, %s709_s24 }
  0x11   : > { %s495_s29 = scalar_lea.hbm %s857_s1, 512 }
  0x12   : > { %p704_p11 = pnand %p437_p9, %p860_p1  ;;  %p496_p12 = scmp.ne.s32.totalorder %s857_s1, %s495_s29 }
  0x13   : > { %p502_p5 = scmp.lt.u32.totalorder %s495_s29, %s857_s1 }
  0x14   : > { %p497_p13 = pneg %p704_p11 }
  0x16   : > { %p498_p0 = pnand %p497_p13, %p496_p12 }
  0x18   : > { %p499_p3 = pneg %p498_p0 }
  0x1a   : > { %p504_p7 = pnand %p502_p5, %p499_p3 }
  0x1c   : > { %507 = shalt.err (!%p504_p7)
}
  0x1d   : > { %s508_s7 = scalar_lea.vmem %s697_s22, 512  ;;  %p516_p2 = scmp.lt.s32.totalorder %s697_s22, %s697_s22 }
  0x1e   : > { %p509_p9 = scmp.ne.s32.totalorder %s697_s22, %s508_s7  ;;  %p517_p6 = scmp.lt.s32.totalorder %s508_s7, %s508_s7 }
  0x20   : > { %p511_p10 = pnand %p509_p9, %p497_p13  ;;  %p518_p4 = por %p517_p6, %p516_p2 }
  0x22   : > { %p512_p1 = pneg %p511_p10 }
  0x24   : > { %p519_p8 = pnand %p518_p4, %p512_p1 }
  0x26   : > { %522 = shalt.err (!%p519_p8)
}
  0x27   : > { %s626_s8 = smov 128   ;;  %s627_s9 = smov 8  }
  0x28   : > { %440 = dma.hbm_to_vmem [thread:$0]  (!%p704_p11), %s857_s1, 512, %s697_s22, [#allocation6], %s626_s8, %s626_s8, %s627_s9  }
  0x29   : > { %p25_p2 = scmp.eq.s32.totalorder %s24_s26, 0  ;;  %p34_p1 = scmp.ne.s32.totalorder %s619_s14, %s615_s13 }
  0x2a   : > { %p35_p4 = scmp.eq.s32.totalorder %s623_s15, 0  ;;  %p450_p6 = scmp.lt.s32.totalorder %s623_s15, 2 }
  0x2b   : > { %s740_s17 = scalar_select %p25_p2, %s619_s14, %s27_s25  }
  0x2c   : > { %p36_p8 = por %p35_p4, %p34_p1  ;;  %p867_p10 = scmp.eq.s32.totalorder %s674_s16, 1 }
  0x2d   : > { %s148_s27 = sand.u32 1, %s619_s14   ;;  %s396_s28 = sshll.u32 %s623_s15, 7 }
  0x2e   : > { %p744_p12 = por %p867_p10, %p34_p1  ;;  %s395_s29 = sshll.u32 %s148_s27, 3 }
  0x2f   : > { %s753_s4 = scalar_lea.hbm %s856_s0, %s396_s28  ;;  %s152_s22 = scalar_lea.vmem [#allocation2], %s395_s29 }
  0x30   : > { %s159_s25 = sshll.u32 %s152_s22, 4  ;;  %p755_p11 = pnand %p450_p6, %p36_p8  ;;  %s759_s25 = int_to_ptr.vmem [resolvable:$true] %s159_s25 }
  0x31   : > { %s149_s5 = scalar_lea.sflag [#allocation3], %s148_s27  ;;  %s523_s6 = scalar_lea.hbm %s753_s4, 128 }
  0x32   : > { %p524_p13 = scmp.ne.s32.totalorder %s753_s4, %s523_s6  ;;  %p525_p0 = pneg %p755_p11 }
  0x33   : > { %s528_s9 = scalar_lea.hbm %s856_s0, 256  ;;  %p529_p7 = scmp.lt.u32.totalorder %s753_s4, %s856_s0 }
  0x34   : > { %p526_p3 = pnand %p525_p0, %p524_p13  ;;  %p530_p9 = scmp.lt.u32.totalorder %s528_s9, %s523_s6 }
  0x35   : > { %p532_p1 = scmp.lt.u32.totalorder %s523_s6, %s753_s4 }
  0x36   : > { %p527_p5 = pneg %p526_p3  ;;  %p531_p2 = por %p530_p9, %p529_p7 }
  0x38   : > { %p533_p4 = por %p532_p1, %p531_p2 }
  0x3a   : > { %p534_p6 = pnand %p533_p4, %p527_p5 }
  0x3c   : > { %537 = shalt.err (!%p534_p6)
}
  0x3d   : > { %s538_s27 = scalar_lea.vmem %s759_s25, 128  ;;  %s628_s28 = smov [#allocation2]  }
  0x3e   : > { %p539_p8 = scmp.ne.s32.totalorder %s759_s25, %s538_s27  ;;  %s543_s29 = sshll.u32 %s628_s28, 4  ;;  %s544_s29 = int_to_ptr.vmem [resolvable:$false] %s543_s29 }
  0x3f   : > { %s545_s23 = scalar_lea.vmem %s544_s29, 256  ;;  %p546_p3 = scmp.lt.s32.totalorder %s759_s25, %s544_s29 }
  0x40   : > { %p541_p10 = pnand %p539_p8, %p525_p0  ;;  %p547_p7 = scmp.lt.s32.totalorder %s545_s23, %s538_s27 }
  0x42   : > { %p542_p13 = pneg %p541_p10  ;;  %p548_p9 = por %p547_p7, %p546_p3 }
  0x44   : > { %p549_p2 = pnand %p548_p9, %p542_p13 }
  0x46   : > { %552 = shalt.err (!%p549_p2)
}
  0x47   : > { %444 = dma.hbm_to_vmem [thread:$0]  (!%p755_p11), %s753_s4, 128, %s759_s25, %s149_s5  }
  0x48   : > { %p870_p5 = scmp.ne.s32.totalorder %s865_s20, 0 }
  0x49   : > { %s789_s30 = sand.u32 (!%p870_p5), 1, %s615_s13   ;;  %p871_p0 = scmp.ne.s32.totalorder (!%p870_p5), %s863_s18, 0 }
  0x4a   : > { %168 = sbr.rel (%p870_p5) target bundleno = 323 (0x143), region = 32  ;;  %s398_s22 = sshll.u32 (!%p870_p5), %s789_s30, 3 }
  0x4b   : > { %s171_s6 = scalar_lea.sflag (!%p870_p5), [#allocation3], %s789_s30  ;;  %s174_s7 = scalar_lea.vmem (!%p870_p5), [#allocation2], %s398_s22 }
  0x51   : > { %598 = dma.done.wait (%p871_p0), %s171_s6, 128  }
  0x52   : > { %600 = vsyncadd (%p871_p0), %s171_s6, 4294967168  ;;  %p872_p11 = scmp.eq.s32.totalorder %s674_s16, 0 }
  0x54   : > { %602 = dma.done.wait (%p872_p11), [#allocation6], 512   ;;  %p873_p1 = pmov %p872_p11 }
  0x55   : > { %v629_v0 = vmov 0.0|0.0   ;;  %vm630_vm0 = vmmov 0   ;;  %v631_v1 = vmov 0.0   ;;  %v210_v2 = vld [vmem:[#allocation5] sm:$0xff]  ;;  %v211_v3 = vld [vmem:[#allocation5 + $0x8] sm:$0xff]  ;;  %v212_v4 = vld [vmem:[#allocation5 + $0x10] sm:$0xff]  ;;  %v289_v13 = vlaneseq }
  0x56   : > { %604 = vsyncadd (%p873_p1), [#allocation6], 4294966784  ;;  %423 = vmatprep.subr.bf16.mxu0 %v629_v0  ;;  %420 = vmatprep.mubr.msk.f32.mxu0 %vm630_vm0, %v631_v1  ;;  %v424_v5 = vpack.c.bf16 %v211_v3, %v210_v2  ;;  %v213_v6 = vld [vmem:[#allocation5 + $0x18] sm:$0xff]  ;;  %vm214_vm1 = vcmask 261120   ;;  %v201_v9 = vld [vmem:[%s858_s2] sm:$0x1] }
  0x57   : > { %v427_v7 = vpack.c.bf16 %v213_v6, %v212_v4  ;;  %v209_v8 = vld [vmem:[%s174_s7] sm:$0xff]  ;;  %v401_v10 = vmul.f32 -1.442695, %v201_v9  ;;  %v290_v14 = vshrl.u32 %v289_v13, 7  ;;  %s404_s4 = sshll.u32 %s674_s16, 7  ;;  %s200_s25 = scalar_lea.vmem [#allocation7], %s398_s22 }
  0x58   : > { %425 = vmatpush3.bf16.msra.mxu0 %v424_v5  ;;  %s311_s26 = sshll.u32 %s200_s25, 4  ;;  %vm295_vm2 = vcmask 523264   ;;  %s812_s9 = scalar_lea.hbm %s859_s3, %s404_s4  ;;  %s814_s26 = int_to_ptr.vmem [resolvable:$true] %s311_s26 }
  0x59   : > { %426 = vmatprep.subr.bf16.mxu0 %v629_v0  ;;  %491 = vpow2.f32 %v401_v10  ;;  %v291_v17 = vsub.s32 0, %v290_v14  ;;  %s298_s10 = scalar_lea.sflag [#allocation4], %s789_s30  ;;  %s553_s16 = scalar_lea.vmem %s814_s26, 128 }
  0x5a   : > { %p554_p4 = scmp.ne.s32.totalorder %s814_s26, %s553_s16  ;;  %s632_s11 = smov [#allocation7]  }
  0x5b   : > { %s557_s27 = sshll.u32 %s632_s11, 4  ;;  %s558_s27 = int_to_ptr.vmem [resolvable:$false] %s557_s27 }
  0x5c   : > { %428 = vmatpush3.bf16.msra.mxu0 %v427_v7  ;;  %p555_p6 = pnand %p554_p4, %p744_p12  ;;  %s559_s28 = scalar_lea.vmem %s558_s27, 256 }
  0x5d   : > { %p560_p10 = scmp.lt.s32.totalorder %s814_s26, %s558_s27  ;;  %p561_p13 = scmp.lt.s32.totalorder %s559_s28, %s553_s16 }
  0x5e   : > { %p556_p8 = pneg %p555_p6 }
  0x5f   : > { %421 = vmatmul.mubr.msk.f32.vlgmr.msra.gmra.mrb[0].mxu0 %vm214_vm1, %v209_v8  ;;  %p562_p3 = por %p561_p13, %p560_p10 }
  0x61   : > { %p563_p7 = pnand %p562_p3, %p556_p8 }
  0x63   : > { %v492_v11 = vpop.eup %491 }
  0x64   : > { %v205_v12 = vadd.f32 1.0, %v492_v11 }
  0x66   : > { %493 = vrcp.f32 %v205_v12 }
  0x70   : > { %v494_v15 = vpop.eup %493 }
  0x71   : > { %v208_v16 = vmul.f32 2.0, %v494_v15 }
  0x73   : > { %v292_v18 = vrot.slane %v208_v16, %v291_v17 }
 0x132   : > { %v284_v19 = vpop.f32.mrb[0].mxu0 }
 0x133   : > { %v294_v20 = vmul.f32 %v292_v18, %v284_v19  ;;  %v422_v21 = vpop.f32.mrb[1].mxu0 }
 0x135   : > { %296 = vst.msk [vmem:[%s200_s25] sm:$0xff] %vm295_vm2, %v294_v20 }
 0x136   : > { %566 = shalt.err (!%p563_p7)
}
 0x137   : > { %s567_s29 = scalar_lea.hbm %s812_s9, 128  ;;  %s571_s22 = scalar_lea.hbm %s859_s3, 256 }
 0x138   : > { %p568_p9 = scmp.ne.s32.totalorder %s812_s9, %s567_s29  ;;  %p572_p0 = scmp.lt.u32.totalorder %s812_s9, %s859_s3 }
 0x139   : > { %p573_p11 = scmp.lt.u32.totalorder %s571_s22, %s567_s29  ;;  %p575_p4 = scmp.lt.u32.totalorder %s567_s29, %s812_s9 }
 0x13a   : > { %p569_p2 = pnand %p568_p9, %p744_p12 }
 0x13b   : > { %p574_p1 = por %p573_p11, %p572_p0 }
 0x13c   : > { %p570_p5 = pneg %p569_p2 }
 0x13d   : > { %p576_p6 = por %p575_p4, %p574_p1 }
 0x13f   : > { %p577_p8 = pnand %p576_p6, %p570_p5 }
 0x141   : > { %580 = shalt.err (!%p577_p8)
}
 0x142   : > { %435 = dma.vmem_to_hbm [thread:$0]  (%p744_p12), %s814_s26, 128, %s812_s9, %s298_s10  }
 0x143 PF: > { %s323_s18 = sand.u32 1, %s611_s12   ;;  %p874_p10 = scmp.ne.s32.totalorder %s864_s19, 0 }
 0x144   : > { %p875_p13 = scmp.ge.s32.totalorder %s623_s15, 2  ;;  %s324_s20 = scalar_lea.sflag [#allocation4], %s323_s18 }
 0x146   : > { %p446_p3 = pnand %p875_p13, %p874_p10 }
 0x148   : > { %606 = dma.done.wait (!%p446_p3), %s324_s20, 128  }
 0x149   : > { %608 = vsyncadd (!%p446_p3), %s324_s20, 4294967168  ;;  %p17_p7 = scmp.ge.s32.totalorder %s709_s24, 4   ;;  %s876_s12 = smov %s615_s13 }
 0x14a   : > { %s877_s13 = smov %s619_s14  ;;  %s878_s14 = smov %s740_s17 }
 0x14b   : > { %s879_s15 = smov %s709_s24  ;;  %19 = sbr.rel (!%p17_p7) target bundleno = 6 (0x6), region = 81 }
 0x152   :  { %329 = vsyncpa [#allocation3], 1 }
 0x153   :  { %331 = vsyncpa [#allocation3 + $0x1], 1 }
 0x154   :  { %332 = vsyncpa [#allocation6], 1 }
 0x155   :  { %333 = vsyncpa [#allocation4], 1 }
 0x156   :  { %335 = vsyncpa [#allocation4 + $0x1], 1 }

</bundles_post_ra>
